<compile_context>
chip_gen: v6e
topology: v6e:2x2x1
jax: 0.10.0
libtpu: 0.0.40
codegen_flags: <defaults>
</compile_context>

<pallas_src>
import functools
import math

import jax
import jax.numpy as jnp
from jax import lax
from jax.experimental import pallas as pl
from jax.experimental.pallas import tpu as pltpu


# ---------------------------------------------------------------------------
# small helpers
# ---------------------------------------------------------------------------
def _round_up(x, m):
    return (x + m - 1) // m * m


def _sigmoid(x):
    return 1.0 / (1.0 + jnp.exp(-x))


def _softplus(x):
    return jnp.maximum(x, 0.0) + jnp.log(1.0 + jnp.exp(-jnp.abs(x)))


def _pick_channel_tile(total, cap=512, quantum=128):
    """Largest multiple of `quantum` <= cap that divides `total`."""
    best = quantum
    t = quantum
    while t <= min(cap, total):
        if total % t == 0:
            best = t
        t += quantum
    return best


def _pick_head_tile(rep, P, cap=1024):
    """Heads per SSD grid step: divides rep, HT*P lane-dense, HT*P <= cap."""
    best = None
    for ht in range(1, rep + 1):
        if rep % ht:
            continue
        if ht * P <= cap and (ht * P) % 128 == 0:
            best = ht
    if best is None:
        for ht in range(1, rep + 1):
            if rep % ht == 0 and ht * P <= cap:
                best = ht
        if best is None:
            best = rep
    return best


# ---------------------------------------------------------------------------
# tiled bf16 matmul (in_proj / out_proj): accumulate directly into o_ref
# ---------------------------------------------------------------------------
def matmul_kernel(x_ref, w_ref, o_ref):
    @pl.when(pl.program_id(2) == 0)
    def _init():
        o_ref[...] = jnp.zeros_like(o_ref)

    o_ref[...] += jnp.dot(x_ref[...], w_ref[...],
                          preferred_element_type=jnp.float32)


def matmul(x, w, *, tm=256, tn=256, tk=512):
    """x: (M, K), w: (K, N) -> (M, N) f32; bf16 MXU inputs, f32 accumulate."""
    M, K = x.shape
    Kw, N = w.shape
    assert K == Kw
    x = x.astype(jnp.bfloat16)
    w = w.astype(jnp.bfloat16)
    tm = min(tm, _round_up(M, 16))
    tk = min(tk, _round_up(K, 128))
    tn = min(tn, _round_up(N, 128))
    Mp, Kp, Np = _round_up(M, tm), _round_up(K, tk), _round_up(N, tn)
    if (Mp, Kp) != (M, K):
        x = jnp.pad(x, ((0, Mp - M), (0, Kp - K)))
    if (Kp, Np) != (K, N):
        w = jnp.pad(w, ((0, Kp - K), (0, Np - N)))
    out = pl.pallas_call(
        matmul_kernel,
        out_shape=jax.ShapeDtypeStruct((Mp, Np), jnp.float32),
        grid=(Mp // tm, Np // tn, Kp // tk),
        in_specs=[
            pl.BlockSpec((tm, tk), lambda i, j, k: (i, k)),
            pl.BlockSpec((tk, tn), lambda i, j, k: (k, j)),
        ],
        out_specs=pl.BlockSpec((tm, tn), lambda i, j, k: (i, j)),
        compiler_params=pltpu.CompilerParams(
            dimension_semantics=("parallel", "parallel", "arbitrary")),
    )(x, w)
    return out[:M, :N]


# ---------------------------------------------------------------------------
# depthwise causal conv1d + SiLU (gridded over batch x channel tiles), bf16 out
# ---------------------------------------------------------------------------
def conv_silu_kernel(xp_ref, w_ref, b_ref, o_ref):
    L = o_ref.shape[1]
    K = w_ref.shape[0]
    acc = jnp.zeros(o_ref.shape, jnp.float32)
    for k in range(K):                        # K is tiny (d_conv=4), unrolled
        acc = acc + xp_ref[:, pl.ds(k, L), :] * w_ref[k]
    acc = acc + b_ref[...]
    o_ref[...] = (acc * _sigmoid(acc)).astype(o_ref.dtype)   # SiLU


def conv1d_silu(xBC, w_klc, conv_b):
    """xBC: (B, L, C) f32;  w_klc: (K, 1, C);  conv_b: (C,) -> (B, L, C) bf16."""
    Bsz, L, C = xBC.shape
    K = w_klc.shape[0]
    Cp = _round_up(C, 128)
    cc = _pick_channel_tile(Cp)
    xp = jnp.pad(xBC, ((0, 0), (K - 1, 0), (0, Cp - C)))   # causal left pad
    w = jnp.pad(w_klc, ((0, 0), (0, 0), (0, Cp - C)))
    b = jnp.pad(conv_b, (0, Cp - C)).reshape(1, Cp)
    out = pl.pallas_call(
        conv_silu_kernel,
        out_shape=jax.ShapeDtypeStruct((Bsz, L, Cp), jnp.bfloat16),
        grid=(Bsz, Cp // cc),
        in_specs=[
            pl.BlockSpec((1, L + K - 1, cc), lambda b_, c_: (b_, 0, c_)),
            pl.BlockSpec((K, 1, cc), lambda b_, c_: (0, 0, c_)),
            pl.BlockSpec((1, cc), lambda b_, c_: (0, c_)),
        ],
        out_specs=pl.BlockSpec((1, L, cc), lambda b_, c_: (b_, 0, c_)),
        compiler_params=pltpu.CompilerParams(
            dimension_semantics=("parallel", "parallel")),
    )(xp, w, b)
    return out[..., :C]


# ---------------------------------------------------------------------------
# chunked SSD selective scan: grid = (batch, head-tile, chunk)
#   - bf16 MXU matmuls, group-batched; lane-dense (N, HT*P) carried state.
# ---------------------------------------------------------------------------
def ssd_chunk_kernel(A_ref, D_ref, dtb_ref, dt_ref, x_ref, B_ref, C_ref,
                     y_ref, state_ref, xw_ref, *, headdim):
    P = headdim
    HT = A_ref.shape[-1]
    Q = x_ref.shape[1]

    @pl.when(pl.program_id(2) == 0)
    def _init():
        state_ref[...] = jnp.zeros_like(state_ref)

    A = A_ref[0]                                  # (1, HT)  (negative)
    Dv = D_ref[0]                                 # (1, HT)
    dtb = dtb_ref[0]                              # (1, HT)
    dt_raw = dt_ref[0, 0]                         # (Q, HT) f32
    x = x_ref[0]                                  # (Q, HT*P) bf16
    Bg = B_ref[0]                                 # (Q, N) bf16
    Cg = C_ref[0]                                 # (Q, N) bf16

    dt = _softplus(dt_raw + dtb)                  # (Q, HT)
    a = dt * A                                    # (Q, HT), <= 0

    # causal structures shared by all heads
    idx_i = lax.broadcasted_iota(jnp.int32, (Q, Q), 0)
    idx_j = lax.broadcasted_iota(jnp.int32, (Q, Q), 1)
    causal = idx_i >= idx_j
    tri = causal.astype(jnp.float32)

    # inclusive cumulative sum of a over time (f32 MXU matmul, tiny)
    cA = jnp.dot(tri, a, preferred_element_type=jnp.float32)   # (Q, HT)
    cAT = cA.T                                                  # (HT, Q)
    exp_cA = jnp.exp(cA)                                        # (Q, HT)
    cA_last = cA[Q - 1:Q, :]                                    # (1, HT)
    exp_last = jnp.exp(cA_last)                                 # (1, HT)
    w_all = jnp.exp(cA_last - cA) * dt                          # (Q, HT)

    # group-shared score matrix and batched inter-chunk term (bf16 MXU)
    BgT = Bg.T                                                  # (N, Q) bf16
    scores = jnp.dot(Cg, BgT, preferred_element_type=jnp.float32)   # (Q, Q)
    y_inter = jnp.dot(Cg, state_ref[...].astype(jnp.bfloat16),
                      preferred_element_type=jnp.float32)       # (Q, HT*P)

    neg_big = jnp.float32(-1e30)
    for h in range(HT):                         # static per-head unroll (small)
        sl = slice(h * P, (h + 1) * P)
        xh = x[:, sl]                                           # (Q, P) bf16
        xdt = xh.astype(jnp.float32) * dt[:, h:h + 1]           # dt_j * x_j

        # intra-chunk (quadratic) term
        decay = jnp.exp(jnp.where(causal,
                                  cA[:, h:h + 1] - cAT[h:h + 1, :], neg_big))
        y_h = jnp.dot((scores * decay).astype(jnp.bfloat16),
                      xdt.astype(jnp.bfloat16),
                      preferred_element_type=jnp.float32)       # (Q, P)

        # inter-chunk term + D skip
        y_h = y_h + exp_cA[:, h:h + 1] * y_inter[:, sl]
        y_h = y_h + Dv[:, h:h + 1] * xh.astype(jnp.float32)

        y_ref[0, :, sl] = y_h.astype(y_ref.dtype)               # direct store

        # stash dt_j * exp(cA_last - cA_j) * x_j for the batched state update
        xw_ref[:, sl] = (xh.astype(jnp.float32)
                         * w_all[:, h:h + 1]).astype(jnp.bfloat16)

    # batched state update: (N, Q) x (Q, HT*P) once per head tile
    dS = jnp.dot(BgT, xw_ref[...], preferred_element_type=jnp.float32)
    for h in range(HT):
        sl = slice(h * P, (h + 1) * P)
        state_ref[:, sl] = exp_last[:, h:h + 1] * state_ref[:, sl] + dS[:, sl]


def ssd_scan(x, dt, Bm, Cm, A_log, D, dt_bias, cfg):
    """x: (B,L,H*P) bf16, dt: (B,L,H) f32, Bm/Cm: (B,L,G*N) bf16 -> (B,L,H*P) f32."""
    Bsz, L, d_inner = x.shape
    H, P = cfg["nheads"], cfg["headdim"]
    G, N = cfg["ngroups"], cfg["d_state"]
    assert H % G == 0
    rep = H // G

    Q = min(cfg.get("chunk_size", 128), L)
    assert Q % 8 == 0, "chunk size must be a multiple of 8"
    Lp = _round_up(L, Q)
    if Lp != L:                                   # pad time to a chunk multiple
        pad = ((0, 0), (0, Lp - L), (0, 0))
        x = jnp.pad(x, pad)
        dt = jnp.pad(dt, pad)
        Bm = jnp.pad(Bm, pad)
        Cm = jnp.pad(Cm, pad)
    nC = Lp // Q

    HT = _pick_head_tile(rep, P)
    assert rep % HT == 0
    assert (HT * P) % 128 == 0 or HT == H, "head tile must be lane-dense"
    assert N % 128 == 0 or G == 1, "d_state must be lane-dense when ngroups > 1"
    n_tiles = H // HT
    tpg = rep // HT                              # head tiles per group

    x = x.astype(jnp.bfloat16)
    Bm = Bm.astype(jnp.bfloat16)
    Cm = Cm.astype(jnp.bfloat16)

    A = (-jnp.exp(A_log)).reshape(n_tiles, 1, HT).astype(jnp.float32)
    Dv = D.reshape(n_tiles, 1, HT).astype(jnp.float32)
    dtb = dt_bias.reshape(n_tiles, 1, HT).astype(jnp.float32)
    dt_t = dt.astype(jnp.float32).reshape(Bsz, Lp, n_tiles, HT)
    dt_t = dt_t.transpose(0, 2, 1, 3)            # (B, n_tiles, Lp, HT)

    kernel = functools.partial(ssd_chunk_kernel, headdim=P)
    y = pl.pallas_call(
        kernel,
        out_shape=jax.ShapeDtypeStruct((Bsz, Lp, d_inner), jnp.float32),
        grid=(Bsz, n_tiles, nC),
        in_specs=[
            pl.BlockSpec((1, 1, HT), lambda b, t, c: (t, 0, 0)),        # A
            pl.BlockSpec((1, 1, HT), lambda b, t, c: (t, 0, 0)),        # D
            pl.BlockSpec((1, 1, HT), lambda b, t, c: (t, 0, 0)),        # dt_bias
            pl.BlockSpec((1, 1, Q, HT), lambda b, t, c: (b, t, c, 0)),  # dt
            pl.BlockSpec((1, Q, HT * P), lambda b, t, c: (b, c, t)),    # x
            pl.BlockSpec((1, Q, N), lambda b, t, c: (b, c, t // tpg)),  # B
            pl.BlockSpec((1, Q, N), lambda b, t, c: (b, c, t // tpg)),  # C
        ],
        out_specs=pl.BlockSpec((1, Q, HT * P), lambda b, t, c: (b, c, t)),
        scratch_shapes=[pltpu.VMEM((N, HT * P), jnp.float32),      # carried state
                        pltpu.VMEM((Q, HT * P), jnp.bfloat16)],    # xw staging
        compiler_params=pltpu.CompilerParams(
            dimension_semantics=("parallel", "parallel", "arbitrary"),
            vmem_limit_bytes=16 * 1024 * 1024),
    )(A, Dv, dtb, dt_t, x, Bm, Cm)
    return y[:, :L, :]


# ---------------------------------------------------------------------------
# gated RMSNorm (norm_before_gate=False), gridded over row tiles
# ---------------------------------------------------------------------------
def rmsnorm_gated_kernel(y_ref, z_ref, w_ref, o_ref):
    y = y_ref[...]
    z = z_ref[...]
    x = y * (z * _sigmoid(z))
    var = jnp.mean(x * x, axis=-1, keepdims=True)
    o_ref[...] = x * lax.rsqrt(var + 1e-5) * w_ref[...]


def rmsnorm_gated(y, z, w, *, tr=256):
    M, D = y.shape
    tr = min(tr, _round_up(M, 8))
    Mp = _round_up(M, tr)
    if Mp != M:
        y = jnp.pad(y, ((0, Mp - M), (0, 0)))
        z = jnp.pad(z, ((0, Mp - M), (0, 0)))
    out = pl.pallas_call(
        rmsnorm_gated_kernel,
        out_shape=jax.ShapeDtypeStruct((Mp, D), jnp.float32),
        grid=(Mp // tr,),
        in_specs=[
            pl.BlockSpec((tr, D), lambda i: (i, 0)),
            pl.BlockSpec((tr, D), lambda i: (i, 0)),
            pl.BlockSpec((1, D), lambda i: (0, 0)),
        ],
        out_specs=pl.BlockSpec((tr, D), lambda i: (i, 0)),
        compiler_params=pltpu.CompilerParams(
            dimension_semantics=("parallel",)),
    )(y, z, w.reshape(1, D))
    return out[:M]


# ---------------------------------------------------------------------------
# full forward pass
# ---------------------------------------------------------------------------
def prepare_params(p):
    """One-time weight prep: pre-transposed bf16 GEMM weights, (K,1,C) conv."""
    q = dict(p)
    q["in_proj_wT"] = p["in_proj_w"].T.astype(jnp.bfloat16)
    q["out_proj_wT"] = p["out_proj_w"].T.astype(jnp.bfloat16)
    q["conv_w_klc"] = jnp.transpose(p["conv_w"], (2, 1, 0))
    return q


def mamba2_forward(u, p, cfg):
    Bsz, L, Dm = u.shape
    d_inner = cfg["d_inner"]
    d_state = cfg["d_state"]
    G = cfg["ngroups"]
    conv_dim = d_inner + 2 * G * d_state

    # in_proj
    zxbcdt = matmul(u.reshape(Bsz * L, Dm), p["in_proj_wT"])
    zxbcdt = zxbcdt.reshape(Bsz, L, -1)
    z = zxbcdt[..., :d_inner]
    xBC = zxbcdt[..., d_inner:d_inner + conv_dim]
    dt = zxbcdt[..., d_inner + conv_dim:]

    # depthwise causal conv1d + SiLU (emits bf16 activations for the scan)
    xBC = conv1d_silu(xBC, p["conv_w_klc"], p["conv_b"])
    x = xBC[..., :d_inner]
    Bm = xBC[..., d_inner:d_inner + G * d_state]
    Cm = xBC[..., d_inner + G * d_state:]

    # chunked SSD selective scan
    y = ssd_scan(x, dt, Bm, Cm, p["A_log"], p["D"], p["dt_bias"], cfg)

    # gated RMSNorm + out_proj
    y = rmsnorm_gated(y.reshape(Bsz * L, d_inner),
                      z.reshape(Bsz * L, d_inner), p["norm_w"])
    out = matmul(y, p["out_proj_wT"])
    return out.reshape(Bsz, L, Dm)


# ---------------------------------------------------------------------------
# pure-JAX reference (sequential recurrence; mirrors the kernel's bf16
# projection GEMMs and bf16 storage of the conv activations)
# ---------------------------------------------------------------------------
def _bf16_matmul(x, w):
    return jnp.dot(x.astype(jnp.bfloat16), w.astype(jnp.bfloat16),
                   preferred_element_type=jnp.float32)


def reference_forward(u, p, cfg):
    Bsz, L, Dm = u.shape
    d_inner = cfg["d_inner"]
    d_state = cfg["d_state"]
    G = cfg["ngroups"]
    H = cfg["nheads"]
    P = cfg["headdim"]
    K = cfg["d_conv"]
    conv_dim = d_inner + 2 * G * d_state

    zxbcdt = _bf16_matmul(u.reshape(Bsz * L, Dm),
                          p["in_proj_w"].T).reshape(Bsz, L, -1)
    z = zxbcdt[..., :d_inner]
    xBC = zxbcdt[..., d_inner:d_inner + conv_dim]
    dt = _softplus(zxbcdt[..., d_inner + conv_dim:] + p["dt_bias"])

    xp = jnp.pad(xBC, ((0, 0), (K - 1, 0), (0, 0)))
    w = p["conv_w"][:, 0, :]                       # (C, K)
    conv = sum(xp[:, k:k + L, :] * w[:, k][None, None, :] for k in range(K))
    conv = conv + p["conv_b"]
    xBC = conv * _sigmoid(conv)
    # mirror the kernel's bf16 storage of the conv activations
    xBC = xBC.astype(jnp.bfloat16).astype(jnp.float32)

    x = xBC[..., :d_inner].reshape(Bsz, L, H, P)
    Bm = xBC[..., d_inner:d_inner + G * d_state].reshape(Bsz, L, G, d_state)
    Cm = xBC[..., d_inner + G * d_state:].reshape(Bsz, L, G, d_state)
    A = -jnp.exp(p["A_log"])
    rep = H // G
    Bh = jnp.repeat(Bm, rep, axis=2)
    Ch = jnp.repeat(Cm, rep, axis=2)

    def step(state, inp):
        x_t, dt_t, B_t, C_t = inp
        dA = jnp.exp(dt_t * A)
        state = dA[..., None, None] * state \
            + (dt_t[..., None] * x_t)[..., None] * B_t[..., None, :]
        y_t = jnp.einsum("bhpn,bhn->bhp", state, C_t) \
            + p["D"][None, :, None] * x_t
        return state, y_t

    state0 = jnp.zeros((Bsz, H, P, d_state), jnp.float32)
    _, ys = lax.scan(step, state0,
                     (x.transpose(1, 0, 2, 3), dt.transpose(1, 0, 2),
                      Bh.transpose(1, 0, 2, 3), Ch.transpose(1, 0, 2, 3)))
    y = ys.transpose(1, 0, 2, 3).reshape(Bsz, L, d_inner)

    xg = y * (z * _sigmoid(z))
    var = jnp.mean(xg * xg, axis=-1, keepdims=True)
    y = xg * lax.rsqrt(var + 1e-5) * p["norm_w"]
    out = _bf16_matmul(y.reshape(Bsz * L, d_inner), p["out_proj_w"].T)
    return out.reshape(Bsz, L, Dm)


# ---------------------------------------------------------------------------
# deterministic parameter init (mirrors Mamba2Simple.__init__ shapes)
# ---------------------------------------------------------------------------
def init_params(key, cfg):
    d_model = cfg["d_model"]
    d_inner = cfg["d_inner"]
    d_state = cfg["d_state"]
    ng = cfg["ngroups"]
    H = cfg["nheads"]
    K = cfg["d_conv"]
    d_in_proj = 2 * d_inner + 2 * ng * d_state + H
    conv_dim = d_inner + 2 * ng * d_state

    ks = jax.random.split(key, 8)
    dt_min, dt_max, dt_init_floor = 0.001, 0.1, 1e-4
    dt = jnp.exp(jax.random.uniform(ks[3], (H,))
                 * (math.log(dt_max) - math.log(dt_min)) + math.log(dt_min))
    dt = jnp.maximum(dt, dt_init_floor)
    dt_bias = dt + jnp.log(-jnp.expm1(-dt))
    A = jax.random.uniform(ks[4], (H,), minval=1.0, maxval=16.0)

    return {
        "in_proj_w": jax.random.normal(ks[0], (d_in_proj, d_model),
                                       jnp.float32) / math.sqrt(d_model),
        "conv_w": jax.random.normal(ks[1], (conv_dim, 1, K), jnp.float32) * 0.2,
        "conv_b": jax.random.normal(ks[2], (conv_dim,), jnp.float32) * 0.1,
        "dt_bias": dt_bias.astype(jnp.float32),
        "A_log": jnp.log(A).astype(jnp.float32),
        "D": jnp.ones((H,), jnp.float32),
        "norm_w": jnp.ones((d_inner,), jnp.float32),
        "out_proj_w": jax.random.normal(ks[5], (d_model, d_inner),
                                        jnp.float32) / math.sqrt(d_inner),
    }


if __name__ == "__main__":
    # small, self-consistent config; chunk_size=32 with seqlen=64 exercises the
    # cross-chunk state carry in the SSD kernel.
    d_model, d_state, d_conv, expand = 64, 64, 4, 2
    headdim, ngroups, chunk_size = 32, 1, 32
    d_inner = expand * d_model
    nheads = d_inner // headdim
    cfg = dict(d_model=d_model, d_state=d_state, d_conv=d_conv,
               d_inner=d_inner, headdim=headdim, nheads=nheads,
               ngroups=ngroups, chunk_size=chunk_size)

    key = jax.random.PRNGKey(0)
    pkey, ukey = jax.random.split(key)
    params = init_params(pkey, cfg)
    kparams = prepare_params(params)

    batch, seqlen = 2, 64
    u = jax.random.normal(ukey, (batch, seqlen, d_model), jnp.float32)

    out = mamba2_forward(u, kparams, cfg)
    out = jax.block_until_ready(out)

    ref = reference_forward(u, params, cfg)
    assert out.shape == (batch, seqlen, d_model)
    assert bool(jnp.all(jnp.isfinite(out)))
    max_err = float(jnp.max(jnp.abs(out - ref)))
    assert bool(jnp.allclose(out, ref, rtol=1e-2, atol=1e-2)), max_err
    print("KERNEL_OK")
</pallas_src>

<mosaic_0001>
module attributes {stable_mosaic.version = 11 : i64} {
  func.func @matmul_kernel(%arg0: i32, %arg1: i32, %arg2: i32, %arg3: memref<128x128xbf16, #tpu.memory_space<vmem>>, %arg4: memref<128x256xbf16, #tpu.memory_space<vmem>>, %arg5: memref<128x256xf32, #tpu.memory_space<vmem>>) attributes {dimension_semantics = [#tpu.dimension_semantics<parallel>, #tpu.dimension_semantics<parallel>, #tpu.dimension_semantics<arbitrary>], iteration_bounds = array<i64: 1, 2, 1>, scalar_prefetch = 0 : i64, scratch_operands = 0 : i64, tpu.core_type = #tpu.core_type<tc>, window_params = [{transform_indices = @transform_0, window_bounds = array<i64: 128, 128>}, {transform_indices = @transform_1, window_bounds = array<i64: 128, 256>}, {transform_indices = @transform_2, window_bounds = array<i64: 128, 256>}]} {
    %c0_i32 = arith.constant 0 : i32
    %0 = arith.cmpi eq, %arg2, %c0_i32 : i32
    %1 = arith.extui %0 : i1 to i32
    %c0_i32_0 = arith.constant 0 : i32
    %2 = arith.cmpi ne, %1, %c0_i32_0 : i32
    scf.if %2 {
      %cst_8 = arith.constant 0.000000e+00 : f32
      %9 = vector.broadcast %cst_8 : f32 to vector<128x256xf32>
      %c0_9 = arith.constant 0 : index
      %c0_10 = arith.constant 0 : index
      %10 = vector.load %arg5[%c0_9, %c0_10] : memref<128x256xf32, #tpu.memory_space<vmem>>, vector<128x256xf32>
      tpu.vector_store %arg5[%c0_9, %c0_10], %9 {strides = array<i32>} : memref<128x256xf32, #tpu.memory_space<vmem>>, vector<128x256xf32>,
    } else {
    }
    %c0 = arith.constant 0 : index
    %c0_1 = arith.constant 0 : index
    %3 = vector.load %arg5[%c0, %c0_1] : memref<128x256xf32, #tpu.memory_space<vmem>>, vector<128x256xf32>
    %c0_2 = arith.constant 0 : index
    %c0_3 = arith.constant 0 : index
    %4 = vector.load %arg3[%c0_2, %c0_3] : memref<128x128xbf16, #tpu.memory_space<vmem>>, vector<128x128xbf16>
    %c0_4 = arith.constant 0 : index
    %c0_5 = arith.constant 0 : index
    %5 = vector.load %arg4[%c0_4, %c0_5] : memref<128x256xbf16, #tpu.memory_space<vmem>>, vector<128x256xbf16>
    %cst = arith.constant dense<0.000000e+00> : vector<128x256xf32>
    %6 = tpu.matmul %4, %5, %cst {dimension_numbers = #tpu.dot_dimension_numbers<[1], [0], [0], [1], [0, 0, 1, 1], [], []>} : vector<128x128xbf16>, vector<128x256xbf16>, vector<128x256xf32> -> vector<128x256xf32>
    %7 = arith.addf %3, %6 : vector<128x256xf32>
    %c0_6 = arith.constant 0 : index
    %c0_7 = arith.constant 0 : index
    %8 = vector.load %arg5[%c0_6, %c0_7] : memref<128x256xf32, #tpu.memory_space<vmem>>, vector<128x256xf32>
    tpu.vector_store %arg5[%c0_6, %c0_7], %7 {strides = array<i32>} : memref<128x256xf32, #tpu.memory_space<vmem>>, vector<128x256xf32>,
    return
  }
  func.func @transform_0(%arg0: i32, %arg1: i32, %arg2: i32) -> (i32, i32) {
    %c0_i32 = arith.constant 0 : i32
    return %arg0, %arg2 : i32, i32
  }
  func.func @transform_1(%arg0: i32, %arg1: i32, %arg2: i32) -> (i32, i32) {
    %c0_i32 = arith.constant 0 : i32
    return %arg2, %arg1 : i32, i32
  }
  func.func @transform_2(%arg0: i32, %arg1: i32, %arg2: i32) -> (i32, i32) {
    %c0_i32 = arith.constant 0 : i32
    return %arg0, %arg1 : i32, i32
  }
}

</mosaic_0001>

<bundles_post_ra>
// kernel: tpu_custom_call.1
= control target key start
LH: loop header
LB: loop body
LE: loop exit
PB: predicated region body
PF: predicated region fallthrough
CT: control target
= control target key end

     0   :  { %7 = vsyncpa [#allocation3], 0  ;;  %s1326_s0 = inlined_call_operand.hbm [shape: bf16[128,128], index: 0, kind: input, shape index: {}]   ;;  %s1327_s1 = inlined_call_operand.hbm [shape: bf16[128,512], index: 1, kind: input, shape index: {}]   ;;  %s1328_s2 = inlined_call_operand.hbm [shape: f32[128,512], index: 2, kind: output, shape index: {}]  }
   0x1   :  { %8 = vsyncpa [#allocation6], 0 }
   0x2   :  { %10 = vsyncpa [#allocation6 + $0x1], 0 }
   0x3   :  { %11 = vsyncpa [#allocation4], 0 }
   0x4   :  { %13 = vsyncpa [#allocation4 + $0x1], 0  ;;  %s1089_s9 = smov 0   ;;  %s1091_s10 = smov 0  }
   0x5   :  { %s1093_s11 = smov 0   ;;  %s1095_s12 = smov 0  }
   0x6   :  { %s1097_s13 = smov 0   ;;  %s1099_s14 = smov 0  }
   0x7 LB: > { %1333 = sst [smem:[#allocation11_spill]] %s1060_s14  ;;  %s748_s15 = sadd.s32 4294967295, %s1060_s14   ;;  %s1060_s14 = sphi %s1099_s14, %s1352_s14   ;;  %s1056_s13 = sphi %s1097_s13, %s1351_s13   ;;  %s1052_s12 = sphi %s1095_s12, %s1350_s12   ;;  %s1048_s11 = sphi %s1093_s11, %s1349_s11   ;;  %s1044_s10 = sphi %s1091_s10, %s1348_s10   ;;  %s1040_s9 = sphi %s1089_s9, %s1347_s9  }
   0x8   : > { %s749_s16 = sadd.s32 4294967294, %s1060_s14   ;;  %p82_p0 = scmp.ne.s32.totalorder %s1048_s11, %s1044_s10 }
   0x9   : > { %p83_p1 = scmp.eq.s32.totalorder %s1060_s14, 0  ;;  %p88_p2 = scmp.ne.s32.totalorder %s1044_s10, %s1040_s9 }
   0xa   : > { %p1126_p3 = scmp.eq.s32.totalorder %s748_s15, 0  ;;  %p114_p5 = scmp.eq.s32.totalorder %s748_s15, 1 }
   0xb   : > { %p1130_p4 = por %p83_p1, %p82_p0  ;;  %p120_p7 = scmp.eq.s32.totalorder %s749_s16, 1 }
   0xc   : > { %p1136_p6 = por %p1126_p3, %p88_p2  ;;  %p1140_p8 = por %p114_p5, %p82_p0 }
   0xd   : > { %p750_p9 = scmp.ge.s32.totalorder %s1060_s14, 1  ;;  %p1145_p10 = por %p120_p7, %p88_p2 }
   0xe   : > { %s1336_s19 = scalar_select %p1136_p6, 1, 0 }
   0xf   : > { %s1337_s20 = scalar_select %p1140_p8, 1, 0 }
  0x10   : > { %s1338_s21 = scalar_select %p1145_p10, 1, 0 }
  0x11   : > { %p127_p11 = scmp.lt.s32.totalorder %s1060_s14, 3  ;;  %s1062_s23 = smov [#allocation2]  }
  0x12   : > { %s143_s24 = sshll.u32 %s1062_s23, 4  ;;  %p828_p1 = scmp.lt.s32.totalorder %s1060_s14, 2  ;;  %s144_s24 = int_to_ptr.vmem [resolvable:$true] %s143_s24 }
  0x13   : > { %p1150_p12 = pnand %p750_p9, %p127_p11  ;;  %s34_s27 = sadd.s32 1, %s1056_s13 }
  0x14   : > { %p1166_p2 = pnand %p828_p1, %p1130_p4  ;;  %s933_s28 = scalar_lea.vmem %s144_s24, 1024 }
  0x15   : > { %p815_p13 = pneg %p1150_p12  ;;  %p934_p9 = scmp.ne.s32.totalorder %s144_s24, %s933_s28 }
  0x16   : > { %p941_p0 = scmp.lt.s32.totalorder %s144_s24, %s144_s24  ;;  %p942_p8 = scmp.lt.s32.totalorder %s933_s28, %s933_s28 }
  0x17   : > { %p1160_p5 = pnand %p815_p13, %p1126_p3 }
  0x18   : > { %p943_p6 = por %p942_p8, %p941_p0 }
  0x19   : > { %p924_p7 = pneg %p1160_p5 }
  0x1b   : > { %p936_p11 = pnand %p934_p9, %p924_p7 }
  0x1d   : > { %p937_p10 = pneg %p936_p11 }
  0x1f   : > { %p944_p13 = pnand %p943_p6, %p937_p10 }
  0x21   : > { %947 = shalt.err (!%p944_p13)
}
  0x22   : > { %s1063_s29 = smov 64   ;;  %s1064_s30 = smov 4  }
  0x23   : > { %818 = dma.hbm_to_vmem [thread:$0]  (!%p1160_p5), %s1326_s0, 1024, %s144_s24, [#allocation3], %s1063_s29, %s1063_s29, %s1064_s30  }
  0x24   : > { %p36_p4 = scmp.ge.s32.totalorder %s34_s27, 2  ;;  %s75_s5 = sadd.s32 1, %s1048_s11 }
  0x25   : > { %s157_s6 = sand.u32 1, %s1048_s11   ;;  %s789_s15 = sshll.u32 %s1056_s13, 7 }
  0x26   : > { %s1354_s27 = smov (%p36_p4, %s34_s27), 0  ;;  %s753_s7 = sshll.u32 %s157_s6, 7 }
  0x27   : > { %s71_s8 = ssub.s32 %s1056_s13, %s1354_s27  ;;  %s170_s23 = scalar_lea.hbm %s1327_s1, %s789_s15 }
  0x28   : > { %p73_p6 = scmp.eq.s32.totalorder %s71_s8, 0  ;;  %s161_s25 = scalar_lea.vmem [#allocation5], %s753_s7 }
  0x29   : > { %s171_s28 = sshll.u32 %s161_s25, 4  ;;  %s158_s24 = scalar_lea.sflag [#allocation6], %s157_s6  ;;  %s172_s28 = int_to_ptr.vmem [resolvable:$true] %s171_s28 }
  0x2a   : > { %s1189_s14 = scalar_select %p73_p6, %s1048_s11, %s75_s5  }
  0x2b   : > { %p950_p8 = pneg %p1166_p2  ;;  %s961_s29 = scalar_lea.vmem %s172_s28, 2048 }
  0x2c   : > { %p962_p10 = scmp.ne.s32.totalorder %s172_s28, %s961_s29  ;;  %s1065_s30 = smov [#allocation5]  }
  0x2d   : > { %s966_s3 = sshll.u32 %s1065_s30, 4  ;;  %s967_s3 = int_to_ptr.vmem [resolvable:$false] %s966_s3 }
  0x2e   : > { %p964_p0 = pnand %p962_p10, %p950_p8  ;;  %s968_s4 = scalar_lea.vmem %s967_s3, 4096 }
  0x2f   : > { %p969_p5 = scmp.lt.s32.totalorder %s172_s28, %s967_s3  ;;  %p970_p7 = scmp.lt.s32.totalorder %s968_s4, %s961_s29 }
  0x30   : > { %p965_p1 = pneg %p964_p0 }
  0x31   : > { %p971_p9 = por %p970_p7, %p969_p5 }
  0x33   : > { %p972_p11 = pnand %p971_p9, %p965_p1 }
  0x35   : > { %975 = shalt.err (!%p972_p11)
}
  0x36   : > { %s1066_s7 = smov 256   ;;  %s1067_s5 = smov 128  }
  0x37   : > { %s1068_s8 = smov 8   ;;  %183 = sbr.rel (%p1150_p12) target bundleno = 337 (0x151), region = 28 }
  0x38   : > { %822 = dma.hbm_to_vmem [thread:$0]  (!%p1166_p2), %s170_s23, 2048, %s172_s28, %s158_s24, %s1066_s7, %s1067_s5, %s1068_s8  }
  0x3c   : > { %1027 = dma.done.wait (%p1126_p3), [#allocation3], 1024  }
  0x3d   : > { %1029 = vsyncadd (%p1126_p3), [#allocation3], 4294966272  ;;  %s1202_s6 = sand.u32 1, %s1044_s10   ;;  %p1342_p2 = scmp.ne.s32.totalorder %s1336_s19, 0 }
  0x3e   : > { %s758_s15 = sshll.u32 %s1202_s6, 7  ;;  %s190_s16 = scalar_lea.sflag [#allocation6], %s1202_s6 }
  0x3f   : > { %s1206_s18 = scalar_lea.vmem [#allocation5], %s758_s15 }
  0x40   : > { %1031 = dma.done.wait (%p1342_p2), %s190_s16, 2048  }
  0x41   : > { %1033 = vsyncadd (%p1342_p2), %s190_s16, 4294965248  ;;  %v1069_v0 = vmov 0   ;;  %v890_v1 = vld [vmem:[%s1206_s18 + $0x74] ss:$8 sps:$4 sm:$0xff]   ;;  %v892_v2 = vld [vmem:[%s1206_s18 + $0x70] ss:$8 sps:$4 sm:$0xff]  }
  0x42   : > { %480 = vmatprep.mubr.bf16.mxu0 %v1069_v0  ;;  %520 = vmatprep.mubr.bf16.mxu1 %v1069_v0  ;;  %v893_v3 = vld [vmem:[%s1206_s18 + $0x64] ss:$8 sps:$4 sm:$0xff]   ;;  %v895_v4 = vld [vmem:[%s1206_s18 + $0x60] ss:$8 sps:$4 sm:$0xff]   ;;  %v896_v5 = vld [vmem:[%s1206_s18 + $0x54] ss:$8 sps:$4 sm:$0xff]  }
  0x43   : > { %448 = vmatprep.subr.bf16.mxu0 %v890_v1  ;;  %791 = vmatprep.subr.bf16.mxu1 %v890_v1  ;;  %v898_v6 = vld [vmem:[%s1206_s18 + $0x50] ss:$8 sps:$4 sm:$0xff]   ;;  %v899_v7 = vld [vmem:[%s1206_s18 + $0x44] ss:$8 sps:$4 sm:$0xff]   ;;  %v901_v8 = vld [vmem:[%s1206_s18 + $0x40] ss:$8 sps:$4 sm:$0xff]  }
  0x44   : > { %449 = vmatpush1.bf16.msra.mxu0 %v892_v2  ;;  %799 = vmatpush1.bf16.msra.mxu1 %v892_v2  ;;  %v902_v9 = vld [vmem:[%s1206_s18 + $0x34] ss:$8 sps:$4 sm:$0xff]   ;;  %v904_v10 = vld [vmem:[%s1206_s18 + $0x30] ss:$8 sps:$4 sm:$0xff]   ;;  %v905_v11 = vld [vmem:[%s1206_s18 + $0x24] ss:$8 sps:$4 sm:$0xff]  }
  0x45   : > { %450 = vmatprep.subr.bf16.mxu0 %v893_v3  ;;  %792 = vmatprep.subr.bf16.mxu1 %v893_v3  ;;  %v907_v12 = vld [vmem:[%s1206_s18 + $0x20] ss:$8 sps:$4 sm:$0xff]   ;;  %v908_v13 = vld [vmem:[%s1206_s18 + $0x14] ss:$8 sps:$4 sm:$0xff]   ;;  %v910_v14 = vld [vmem:[%s1206_s18 + $0x10] ss:$8 sps:$4 sm:$0xff]  }
  0x46   : > { %v911_v15 = vld [vmem:[%s1206_s18 + $0x4] ss:$8 sps:$4 sm:$0xff]   ;;  %v913_v16 = vld [vmem:[%s1206_s18] ss:$8 sps:$4 sm:$0xff]   ;;  %v918_v21 = vld [vmem:[#allocation2 + $0x10] sm:$0xff]   ;;  %s759_s17 = sshll.u32 %s1202_s6, 8 }
  0x47   : > { %v914_v17 = vld [vmem:[#allocation2] sm:$0xff]   ;;  %v916_v19 = vld [vmem:[#allocation2 + $0x8] sm:$0xff]   ;;  %v919_v22 = vld [vmem:[#allocation2 + $0x30] sm:$0xff]   ;;  %s1237_s19 = scalar_lea.vmem [#allocation7], %s759_s17  ;;  %s790_s22 = sshll.u32 %s1052_s12, 8 }
  0x48   : > { %451 = vmatpush1.bf16.msra.mxu0 %v895_v4  ;;  %800 = vmatpush1.bf16.msra.mxu1 %v895_v4  ;;  %v915_v18 = vld [vmem:[#allocation2 + $0x20] sm:$0xff]   ;;  %v917_v20 = vld [vmem:[#allocation2 + $0x28] sm:$0xff]   ;;  %v920_v23 = vld [vmem:[#allocation2 + $0x18] sm:$0xff]   ;;  %s642_s26 = sshll.u32 %s1237_s19, 4  ;;  %s1272_s28 = scalar_lea.hbm %s1328_s2, %s790_s22  ;;  %s1274_s26 = int_to_ptr.vmem [resolvable:$true] %s642_s26 }
  0x49   : > { %452 = vmatprep.subr.bf16.mxu0 %v896_v5  ;;  %793 = vmatprep.subr.bf16.mxu1 %v896_v5  ;;  %v921_v24 = vld [vmem:[#allocation2 + $0x38] sm:$0xff]   ;;  %s626_s12 = scalar_lea.sflag [#allocation4], %s1202_s6  ;;  %s976_s24 = scalar_lea.vmem %s1274_s26, 4096 }
  0x4a   : > { %p977_p3 = scmp.ne.s32.totalorder %s1274_s26, %s976_s24  ;;  %p1343_p12 = scmp.ne.s32.totalorder %s1337_s20, 0 }
  0x4b   : > { %s1070_s29 = smov [#allocation7]  }
  0x4c   : > { %453 = vmatpush1.bf16.msra.mxu0 %v898_v6  ;;  %801 = vmatpush1.bf16.msra.mxu1 %v898_v6  ;;  %p978_p13 = pnand %p977_p3, %p1343_p12  ;;  %s980_s30 = sshll.u32 %s1070_s29, 4  ;;  %s981_s30 = int_to_ptr.vmem [resolvable:$false] %s980_s30 }
  0x4d   : > { %454 = vmatprep.subr.bf16.mxu0 %v899_v7  ;;  %794 = vmatprep.subr.bf16.mxu1 %v899_v7  ;;  %s982_s3 = scalar_lea.vmem %s981_s30, 8192  ;;  %p983_p6 = scmp.lt.s32.totalorder %s1274_s26, %s981_s30 }
  0x4e   : > { %p979_p4 = pneg %p978_p13  ;;  %p984_p8 = scmp.lt.s32.totalorder %s982_s3, %s976_s24 }
  0x50   : > { %455 = vmatpush1.bf16.msra.mxu0 %v901_v8  ;;  %802 = vmatpush1.bf16.msra.mxu1 %v901_v8  ;;  %p985_p10 = por %p984_p8, %p983_p6 }
  0x51   : > { %456 = vmatprep.subr.bf16.mxu0 %v902_v9  ;;  %795 = vmatprep.subr.bf16.mxu1 %v902_v9 }
  0x52   : > { %p986_p0 = pnand %p985_p10, %p979_p4 }
  0x54   : > { %457 = vmatpush1.bf16.msra.mxu0 %v904_v10  ;;  %803 = vmatpush1.bf16.msra.mxu1 %v904_v10 }
  0x55   : > { %458 = vmatprep.subr.bf16.mxu0 %v905_v11  ;;  %796 = vmatprep.subr.bf16.mxu1 %v905_v11 }
  0x58   : > { %459 = vmatpush1.bf16.msra.mxu0 %v907_v12  ;;  %804 = vmatpush1.bf16.msra.mxu1 %v907_v12 }
  0x59   : > { %460 = vmatprep.subr.bf16.mxu0 %v908_v13  ;;  %797 = vmatprep.subr.bf16.mxu1 %v908_v13 }
  0x5c   : > { %461 = vmatpush1.bf16.msra.mxu0 %v910_v14  ;;  %805 = vmatpush1.bf16.msra.mxu1 %v910_v14 }
  0x5d   : > { %462 = vmatprep.subr.bf16.mxu0 %v911_v15  ;;  %798 = vmatprep.subr.bf16.mxu1 %v911_v15 }
  0x60   : > { %463 = vmatpush1.bf16.msra.mxu0 %v913_v16  ;;  %806 = vmatpush1.bf16.msra.mxu1 %v913_v16 }
  0x63   : > { %481 = vmatmul.mubr.bf16.vlgmr.msra.gmra.mxu0 %v914_v17  ;;  %521 = vmatmul.mubr.bf16.vlgmr.msra.gmra.mxu1 %v915_v18 }
  0x64   : > { %490 = vmatprep.mubr.bf16.mxu0 %v1069_v0  ;;  %530 = vmatprep.mubr.bf16.mxu1 %v1069_v0 }
  0x6b   : > { %491 = vmatmul.mubr.bf16.gmra.mxu0 %v916_v19  ;;  %531 = vmatmul.mubr.bf16.gmra.mxu1 %v917_v20 }
  0x6c   : > { %500 = vmatprep.mubr.bf16.mxu0 %v1069_v0  ;;  %540 = vmatprep.mubr.bf16.mxu1 %v1069_v0 }
  0x73   : > { %501 = vmatmul.mubr.bf16.gmra.mxu0 %v918_v21  ;;  %541 = vmatmul.mubr.bf16.gmra.mxu1 %v919_v22 }
  0x74   : > { %510 = vmatprep.mubr.bf16.mxu0 %v1069_v0  ;;  %550 = vmatprep.mubr.bf16.mxu1 %v1069_v0 }
  0x7b   : > { %511 = vmatmul.mubr.bf16.gmra.mxu0 %v920_v23  ;;  %551 = vmatmul.mubr.bf16.gmra.mxu1 %v921_v24 }
 0x123   : > { %v482_v25 = vpop.f32.mrf.mxu0  ;;  %v522_v26 = vpop.f32.mrf.mxu1 }
 0x124   : > { %593 = vst [vmem:[%s1237_s19] sm:$0xff] %v482_v25  ;;  %609 = vst [vmem:[%s1237_s19 + $0x80] sm:$0xff] %v522_v26 }
 0x125   : > { %v484_v27 = vpop.f32.mrf.mxu0  ;;  %v524_v28 = vpop.f32.mrf.mxu1 }
 0x126   : > { %594 = vst [vmem:[%s1237_s19 + $0x8] sm:$0xff] %v484_v27  ;;  %610 = vst [vmem:[%s1237_s19 + $0x88] sm:$0xff] %v524_v28 }
 0x127   : > { %v486_v29 = vpop.f32.mrf.mxu0  ;;  %v526_v30 = vpop.f32.mrf.mxu1 }
 0x128   : > { %595 = vst [vmem:[%s1237_s19 + $0x10] sm:$0xff] %v486_v29  ;;  %611 = vst [vmem:[%s1237_s19 + $0x90] sm:$0xff] %v526_v30 }
 0x129   : > { %v488_v31 = vpop.f32.mrf.mxu0  ;;  %v528_v32 = vpop.f32.mrf.mxu1 }
 0x12a   : > { %596 = vst [vmem:[%s1237_s19 + $0x18] sm:$0xff] %v488_v31  ;;  %612 = vst [vmem:[%s1237_s19 + $0x98] sm:$0xff] %v528_v32 }
 0x12b   : > { %v492_v33 = vpop.f32.mrf.mxu0  ;;  %v532_v34 = vpop.f32.mrf.mxu1 }
 0x12c   : > { %597 = vst [vmem:[%s1237_s19 + $0x20] sm:$0xff] %v492_v33  ;;  %613 = vst [vmem:[%s1237_s19 + $0xa0] sm:$0xff] %v532_v34 }
 0x12d   : > { %v494_v35 = vpop.f32.mrf.mxu0  ;;  %v534_v36 = vpop.f32.mrf.mxu1 }
 0x12e   : > { %598 = vst [vmem:[%s1237_s19 + $0x28] sm:$0xff] %v494_v35  ;;  %614 = vst [vmem:[%s1237_s19 + $0xa8] sm:$0xff] %v534_v36 }
 0x12f   : > { %v496_v37 = vpop.f32.mrf.mxu0  ;;  %v536_v38 = vpop.f32.mrf.mxu1 }
 0x130   : > { %599 = vst [vmem:[%s1237_s19 + $0x30] sm:$0xff] %v496_v37  ;;  %615 = vst [vmem:[%s1237_s19 + $0xb0] sm:$0xff] %v536_v38 }
 0x131   : > { %v498_v39 = vpop.f32.mrf.mxu0  ;;  %v538_v40 = vpop.f32.mrf.mxu1 }
 0x132   : > { %600 = vst [vmem:[%s1237_s19 + $0x38] sm:$0xff] %v498_v39  ;;  %616 = vst [vmem:[%s1237_s19 + $0xb8] sm:$0xff] %v538_v40 }
 0x133   : > { %v502_v41 = vpop.f32.mrf.mxu0  ;;  %v542_v42 = vpop.f32.mrf.mxu1 }
 0x134   : > { %601 = vst [vmem:[%s1237_s19 + $0x40] sm:$0xff] %v502_v41  ;;  %617 = vst [vmem:[%s1237_s19 + $0xc0] sm:$0xff] %v542_v42 }
 0x135   : > { %v504_v43 = vpop.f32.mrf.mxu0  ;;  %v544_v44 = vpop.f32.mrf.mxu1 }
 0x136   : > { %602 = vst [vmem:[%s1237_s19 + $0x48] sm:$0xff] %v504_v43  ;;  %618 = vst [vmem:[%s1237_s19 + $0xc8] sm:$0xff] %v544_v44 }
 0x137   : > { %v506_v45 = vpop.f32.mrf.mxu0  ;;  %v546_v46 = vpop.f32.mrf.mxu1 }
 0x138   : > { %603 = vst [vmem:[%s1237_s19 + $0x50] sm:$0xff] %v506_v45  ;;  %619 = vst [vmem:[%s1237_s19 + $0xd0] sm:$0xff] %v546_v46 }
 0x139   : > { %v508_v47 = vpop.f32.mrf.mxu0  ;;  %v548_v48 = vpop.f32.mrf.mxu1 }
 0x13a   : > { %604 = vst [vmem:[%s1237_s19 + $0x58] sm:$0xff] %v508_v47  ;;  %620 = vst [vmem:[%s1237_s19 + $0xd8] sm:$0xff] %v548_v48 }
 0x13b   : > { %v512_v49 = vpop.f32.mrf.mxu0  ;;  %v552_v50 = vpop.f32.mrf.mxu1 }
 0x13c   : > { %605 = vst [vmem:[%s1237_s19 + $0x60] sm:$0xff] %v512_v49  ;;  %621 = vst [vmem:[%s1237_s19 + $0xe0] sm:$0xff] %v552_v50 }
 0x13d   : > { %v514_v51 = vpop.f32.mrf.mxu0  ;;  %v554_v52 = vpop.f32.mrf.mxu1 }
 0x13e   : > { %606 = vst [vmem:[%s1237_s19 + $0x68] sm:$0xff] %v514_v51  ;;  %622 = vst [vmem:[%s1237_s19 + $0xe8] sm:$0xff] %v554_v52 }
 0x13f   : > { %v516_v53 = vpop.f32.mrf.mxu0  ;;  %v556_v54 = vpop.f32.mrf.mxu1 }
 0x140   : > { %607 = vst [vmem:[%s1237_s19 + $0x70] sm:$0xff] %v516_v53  ;;  %623 = vst [vmem:[%s1237_s19 + $0xf0] sm:$0xff] %v556_v54 }
 0x141   : > { %v518_v55 = vpop.f32.mrf.mxu0  ;;  %v558_v56 = vpop.f32.mrf.mxu1 }
 0x142   : > { %608 = vst [vmem:[%s1237_s19 + $0x78] sm:$0xff] %v518_v55  ;;  %624 = vst [vmem:[%s1237_s19 + $0xf8] sm:$0xff] %v558_v56 }
 0x143   : > { %989 = shalt.err (!%p986_p0)
}
 0x144   : > { %s990_s4 = scalar_lea.hbm %s1272_s28, 4096  ;;  %s994_s8 = scalar_lea.hbm %s1328_s2, 8192 }
 0x145   : > { %p991_p1 = scmp.ne.s32.totalorder %s1272_s28, %s990_s4  ;;  %p995_p9 = scmp.lt.s32.totalorder %s1272_s28, %s1328_s2 }
 0x146   : > { %p996_p11 = scmp.lt.s32.totalorder %s994_s8, %s990_s4 }
 0x147   : > { %p992_p5 = pnand %p991_p1, %p1343_p12 }
 0x148   : > { %p997_p2 = por %p996_p11, %p995_p9 }
 0x149   : > { %p993_p7 = pneg %p992_p5 }
 0x14b   : > { %p998_p3 = pnand %p997_p2, %p993_p7 }
 0x14d   : > { %1001 = shalt.err (!%p998_p3)
}
 0x14e   : > { %s1071_s18 = smov 256   ;;  %s1072_s17 = smov 512  }
 0x14f   : > { %s1073_s19 = smov 16  }
 0x150   : > { %813 = dma.vmem_to_hbm [thread:$0]  (%p1343_p12), %s1274_s26, 4096, %s1272_s28, %s626_s12, %s1071_s18, %s1072_s17, %s1073_s19  }
 0x151 PF: > { %s1344_s22 = sld [smem:[#allocation11_spill]]  ;;  %s657_s23 = sand.u32 1, %s1040_s9  }
 0x152   : > { %p1345_p13 = scmp.ne.s32.totalorder %s1338_s21, 0  ;;  %s658_s25 = scalar_lea.sflag [#allocation4], %s657_s23 }
 0x157   : > { %p1346_p4 = scmp.ge.s32.totalorder %s1344_s22, 2 }
 0x159   : > { %p824_p6 = pnand %p1346_p4, %p1345_p13 }
 0x15b   : > { %p825_p8 = pneg %p824_p6 }
 0x15d   : > { %1035 = dma.done.wait (%p825_p8), %s658_s25, 4096  }
 0x15e   : > { %1037 = vsyncadd (%p825_p8), %s658_s25, 4294963200  ;;  %s19_s24 = sadd.s32 1, %s1344_s22   ;;  %s1347_s9 = smov %s1044_s10 }
 0x15f   : > { %p16_p10 = scmp.ge.s32.totalorder %s19_s24, 4   ;;  %s1348_s10 = smov %s1048_s11 }
 0x160   : > { %s1349_s11 = smov %s1189_s14  ;;  %s1350_s12 = smov %s1056_s13 }
 0x161   : > { %s1351_s13 = smov %s1354_s27  ;;  %s1352_s14 = smov %s19_s24 }
 0x162   :  { %18 = sbr.rel (!%p16_p10) target bundleno = 7 (0x7), region = 83 }
 0x167   :  { %663 = vsyncpa [#allocation3], 1 }
 0x168   :  { %665 = vsyncpa [#allocation3 + $0x1], 1 }
 0x169   :  { %666 = vsyncpa [#allocation6], 1 }
 0x16a   :  { %668 = vsyncpa [#allocation6 + $0x1], 1 }
 0x16b   :  { %669 = vsyncpa [#allocation4], 1 }
 0x16c   :  { %671 = vsyncpa [#allocation4 + $0x1], 1 }

</bundles_post_ra>
